<compile_context>
chip_gen: v6e
topology: v6e:2x2x1
jax: 0.10.0
libtpu: 0.0.40
codegen_flags: <defaults>
</compile_context>

<pallas_src>
import math

import jax
import jax.numpy as jnp
from jax.experimental import pallas as pl
from jax.experimental.pallas import tpu as pltpu


def _round_down(x: int, m: int) -> int:
    return (x // m) * m


def _make_gelu_kernel(use_tanh_approx: bool):
    if use_tanh_approx:
        # Tanh-form GeLU: transcendental goes to the EUP slot (free vs. VALU).
        def kernel(x_ref, o_ref):
            x = x_ref[...].astype(jnp.float32)
            c = jnp.float32(math.sqrt(2.0 / math.pi))
            inner = c * (x + jnp.float32(0.044715) * (x * x * x))
            o_ref[...] = (0.5 * x * (1.0 + jnp.tanh(inner))).astype(o_ref.dtype)
    else:
        # Exact erf GeLU, f32 internal math.
        def kernel(x_ref, o_ref):
            x = x_ref[...].astype(jnp.float32)
            y = 0.5 * x * (1.0 + jax.lax.erf(x * jnp.float32(1.0 / math.sqrt(2.0))))
            o_ref[...] = y.astype(o_ref.dtype)
    return kernel


def _default_tile_bytes() -> int:
    # v5e scoped-VMEM default is 16 MiB -> keep 2 MiB/buffer; v6e/v7x (32 MiB
    # scoped default) -> 4 MiB/buffer (fewer ~0.35 us grid-step overheads).
    try:
        kind = jax.devices()[0].device_kind.lower()
    except Exception:
        return 2 * 1024 * 1024
    if "v5" in kind:
        return 2 * 1024 * 1024
    return 4 * 1024 * 1024


def gelu_pallas(x: jax.Array, *, target_tile_bytes: int | None = None) -> jax.Array:
    """GeLU over any shape / float dtype, with zero wrapper-side HBM copies."""
    orig_shape = x.shape
    orig_dtype = x.dtype
    n = x.size
    if n == 0:
        return x
    if not jnp.issubdtype(orig_dtype, jnp.floating):
        raise ValueError(f"gelu_pallas requires a floating dtype, got {orig_dtype}")

    # Mosaic has no real f64 support: explicitly compute (and round-trip) in f32.
    downcast = orig_dtype not in (jnp.float32, jnp.bfloat16, jnp.float16)
    io_dtype = jnp.float32 if downcast else orig_dtype
    if downcast:
        x = x.astype(jnp.float32)

    itemsize = jnp.dtype(io_dtype).itemsize
    row_align = {4: 8, 2: 16, 1: 32}[itemsize]

    if target_tile_bytes is None:
        target_tile_bytes = _default_tile_bytes()
    # 2x in + 2x out double-buffered tiles must stay well inside scoped VMEM
    # even on v7x (32 MiB scoped / 64 MiB physical): cap at 6 MiB/buffer.
    target_tile_bytes = min(target_tile_bytes, 6 * 1024 * 1024)

    # Free, layout-preserving collapse of leading dims; last dim stays the lane
    # dimension.  No pad / ravel / slice for ANY shape.
    cols = orig_shape[-1] if x.ndim >= 2 else n
    rows = n // cols
    x2d = x.reshape(rows, cols)

    bytes_per_row = cols * itemsize
    if row_align * bytes_per_row <= target_tile_bytes:
        # Common case: full-width row tiles (lane-dense when cols % 128 == 0).
        tile_cols = cols
        tile_rows = max(row_align, _round_down(target_tile_bytes // bytes_per_row, row_align))
        tile_rows = min(tile_rows, rows)
    else:
        # Very wide last dim: split lanes in multiples of 128 so the minimum
        # tile does not blow past the VMEM budget (matters on v7x).
        tile_rows = min(row_align, rows)
        tile_cols = min(cols, max(128, _round_down(target_tile_bytes // (tile_rows * itemsize), 128)))

    row_steps = pl.cdiv(rows, tile_rows)
    col_steps = pl.cdiv(cols, tile_cols)

    # Keep enough grid steps for double-buffering on each TensorCore after
    # megacore sharding (v7x: 2 TCs) — aim for >= 8 steps on non-tiny inputs.
    min_steps = 8
    if n * itemsize >= (1 << 20) and row_steps * col_steps < min_steps and rows > row_align:
        want_row_steps = max(1, min_steps // col_steps)
        cand = max(row_align, _round_down(pl.cdiv(rows, want_row_steps), row_align))
        if cand < tile_rows:
            tile_rows = cand
            row_steps = pl.cdiv(rows, tile_rows)

    grid = (row_steps, col_steps)

    # Tanh-form GeLU only for 16-bit I/O (accuracy budget allows it there);
    # exact erf for f32 I/O.
    kernel = _make_gelu_kernel(itemsize == 2)

    cost = pl.CostEstimate(
        flops=10 * n,
        transcendentals=n,
        bytes_accessed=2 * n * itemsize,
    )

    out2d = pl.pallas_call(
        kernel,
        out_shape=jax.ShapeDtypeStruct((rows, cols), io_dtype),
        grid_spec=pltpu.PrefetchScalarGridSpec(
            num_scalar_prefetch=0,
            grid=grid,
            in_specs=[pl.BlockSpec((tile_rows, tile_cols), lambda i, j: (i, j))],
            out_specs=pl.BlockSpec((tile_rows, tile_cols), lambda i, j: (i, j)),
        ),
        compiler_params=pltpu.CompilerParams(
            dimension_semantics=("parallel", "parallel"),
            vmem_limit_bytes=32 * 1024 * 1024,
        ),
        cost_estimate=cost,
    )(x2d)

    out = out2d.reshape(orig_shape)
    if downcast:
        out = out.astype(orig_dtype)
    return out


def gelu_ref(x):
    return x * 0.5 * (1.0 + jax.lax.erf(x / math.sqrt(2.0)))


if __name__ == "__main__":
    key = jax.random.PRNGKey(0)
    k1, k2, k3, k4 = jax.random.split(key, 4)

    # 1) Relaxed fast path: leading-dim product 3*7=21 (not a multiple of 8),
    #    128-aligned last dim -> no pad/ravel/slice, full-extent row block.
    x1 = jax.random.normal(k1, (3, 7, 256), dtype=jnp.float32)
    y1 = gelu_pallas(x1)
    jax.block_until_ready(y1)
    assert y1.shape == x1.shape and y1.dtype == x1.dtype
    assert jnp.allclose(y1, gelu_ref(x1), atol=1e-6, rtol=1e-6), "ragged-lead mismatch"

    # 2) Ragged last dim (32): handled with full-extent lane block, zero copies.
    x2 = jax.random.normal(k2, (2, 8, 32), dtype=jnp.float32)
    y2 = gelu_pallas(x2)
    jax.block_until_ready(y2)
    assert y2.shape == x2.shape and y2.dtype == x2.dtype
    assert jnp.allclose(y2, gelu_ref(x2), atol=1e-6, rtol=1e-6), "ragged-cols mismatch"

    # 3) bf16 I/O: tanh-form GeLU (EUP transcendental), f32 internal math.
    x3 = jax.random.normal(k3, (4, 16, 128), dtype=jnp.float32).astype(jnp.bfloat16)
    y3 = gelu_pallas(x3)
    jax.block_until_ready(y3)
    ref3 = gelu_ref(x3.astype(jnp.float32))
    assert y3.shape == x3.shape and y3.dtype == jnp.bfloat16
    assert jnp.allclose(y3.astype(jnp.float32), ref3, atol=2e-2, rtol=2e-2), "bf16 mismatch"

    # 4) Medium tensor: exercises the multi-step grid (>=4 steps per TC after
    #    v7x megacore sharding) while staying small.
    x4 = jax.random.normal(k4, (8, 512, 256), dtype=jnp.float32)
    y4 = gelu_pallas(x4)
    jax.block_until_ready(y4)
    assert jnp.allclose(y4, gelu_ref(x4), atol=1e-6, rtol=1e-6), "multi-step mismatch"

    print("KERNEL_OK")
</pallas_src>

<mosaic_0001>
module attributes {stable_mosaic.version = 11 : i64} {
  func.func @kernel(%arg0: i32, %arg1: i32, %arg2: memref<21x256xf32, #tpu.memory_space<vmem>>, %arg3: memref<21x256xf32, #tpu.memory_space<vmem>>) attributes {dimension_semantics = [#tpu.dimension_semantics<parallel>, #tpu.dimension_semantics<parallel>], iteration_bounds = array<i64: 1, 1>, scalar_prefetch = 0 : i64, scratch_operands = 0 : i64, tpu.core_type = #tpu.core_type<tc>, window_params = [{transform_indices = @transform_0, window_bounds = array<i64: 21, 256>}, {transform_indices = @transform_1, window_bounds = array<i64: 21, 256>}]} {
    %c0 = arith.constant 0 : index
    %c0_0 = arith.constant 0 : index
    %0 = vector.load %arg2[%c0, %c0_0] : memref<21x256xf32, #tpu.memory_space<vmem>>, vector<21x256xf32>
    %cst = arith.constant 5.000000e-01 : f32
    %1 = vector.broadcast %cst : f32 to vector<21x256xf32>
    %2 = arith.mulf %1, %0 : vector<21x256xf32>
    %cst_1 = arith.constant 0.707106769 : f32
    %3 = vector.broadcast %cst_1 : f32 to vector<21x256xf32>
    %4 = arith.mulf %0, %3 : vector<21x256xf32>
    %5 = math.erf %4 : vector<21x256xf32>
    %cst_2 = arith.constant 1.000000e+00 : f32
    %6 = vector.broadcast %cst_2 : f32 to vector<21x256xf32>
    %7 = arith.addf %6, %5 : vector<21x256xf32>
    %8 = arith.mulf %2, %7 : vector<21x256xf32>
    %c0_3 = arith.constant 0 : index
    %c0_4 = arith.constant 0 : index
    %9 = vector.load %arg3[%c0_3, %c0_4] : memref<21x256xf32, #tpu.memory_space<vmem>>, vector<21x256xf32>
    tpu.vector_store %arg3[%c0_3, %c0_4], %8 {strides = array<i32>} : memref<21x256xf32, #tpu.memory_space<vmem>>, vector<21x256xf32>,
    return
  }
  func.func @transform_0(%arg0: i32, %arg1: i32) -> (i32, i32) {
    %c0_i32 = arith.constant 0 : i32
    return %arg0, %arg1 : i32, i32
  }
  func.func @transform_1(%arg0: i32, %arg1: i32) -> (i32, i32) {
    %c0_i32 = arith.constant 0 : i32
    return %arg0, %arg1 : i32, i32
  }
}

</mosaic_0001>

<bundles_post_ra>
// kernel: tpu_custom_call.1
= control target key start
LH: loop header
LB: loop body
LE: loop exit
PB: predicated region body
PF: predicated region fallthrough
CT: control target
= control target key end

     0   :  { %6 = vsyncpa [#allocation3], 0  ;;  %s168_s0 = inlined_call_operand.hbm [shape: f32[21,256], index: 0, kind: input, shape index: {}]   ;;  %s169_s1 = inlined_call_operand.hbm [shape: f32[21,256], index: 1, kind: output, shape index: {}]  }
   0x1   :  { %7 = vsyncpa [#allocation4], 0  ;;  %s142_s6 = smov [#allocation2]  }
   0x2   :  { %s13_s7 = sshll.u32 %s142_s6, 4  ;;  %s14_s7 = int_to_ptr.vmem [resolvable:$true] %s13_s7 }
   0x3   :  { %s106_s8 = scalar_lea.vmem %s14_s7, 768  ;;  %p111_p1 = scmp.lt.s32.totalorder %s14_s7, %s14_s7 }
   0x4   :  { %p107_p0 = scmp.ne.s32.totalorder %s14_s7, %s106_s8  ;;  %p112_p2 = scmp.lt.s32.totalorder %s106_s8, %s106_s8 }
   0x6   :  { %p113_p3 = por %p112_p2, %p111_p1 }
   0x8   :  { %p114_p4 = pnand %p113_p3, %p107_p0 }
   0xa   :  { %117 = shalt.err (!%p114_p4)
}
   0xb   :  { %s143_s9 = smov 256   ;;  %s144_s10 = smov 16  }
   0xc   :  { %19 = dma.hbm_to_vmem [thread:$0]  %s168_s0, 768, %s14_s7, [#allocation3], %s143_s9, %s143_s9, %s144_s10  }
   0xd   :  { %138 = dma.done.wait [#allocation3], 768  }
   0xe   :  { %139 = vsyncadd [#allocation3], 4294966528  ;;  %v23_v0 = vld [vmem:[#allocation2] sm:$0xff]  ;;  %v24_v1 = vld [vmem:[#allocation2 + $0x8] sm:$0xff]  ;;  %s145_s0 = smov [#allocation5]  }
   0xf   :  { %v25_v2 = vld [vmem:[#allocation2 + $0x10] sm:$0xff]  ;;  %v35_v3 = vmul.f32 0.70710677, %v23_v0  ;;  %v36_v4 = vmul.f32 0.70710677, %v24_v1  ;;  %v26_v6 = vld [vmem:[#allocation2 + $0x18] sm:$0xff] }
  0x10   :  { %v37_v5 = vmul.f32 0.70710677, %v25_v2  ;;  %v27_v7 = vld [vmem:[#allocation2 + $0x20] sm:$0x1f]  ;;  %v38_v8 = vmul.f32 0.70710677, %v26_v6 }
  0x11   :  { %86 = verf.f32 %v35_v3  ;;  %v28_v9 = vld [vmem:[#allocation2 + $0x28] sm:$0x1f]  ;;  %v39_v10 = vmul.f32 0.70710677, %v27_v7  ;;  %v29_v12 = vmul.f32 0.5, %v23_v0  ;;  %v30_v14 = vmul.f32 0.5, %v24_v1 }
  0x12   :  { %88 = verf.f32 %v36_v4  ;;  %v40_v11 = vmul.f32 0.70710677, %v28_v9  ;;  %v31_v17 = vmul.f32 0.5, %v25_v2  ;;  %v32_v20 = vmul.f32 0.5, %v26_v6  ;;  %s70_s13 = sshll.u32 %s145_s0, 4  ;;  %s71_s13 = int_to_ptr.vmem [resolvable:$true] %s70_s13 }
  0x13   :  { %90 = verf.f32 %v37_v5  ;;  %v33_v24 = vmul.f32 0.5, %v27_v7  ;;  %v34_v28 = vmul.f32 0.5, %v28_v9  ;;  %s118_s14 = scalar_lea.vmem %s71_s13, 768  ;;  %p123_p6 = scmp.lt.s32.totalorder %s71_s13, %s71_s13 }
  0x14   :  { %92 = verf.f32 %v38_v8  ;;  %p119_p5 = scmp.ne.s32.totalorder %s71_s13, %s118_s14  ;;  %p124_p7 = scmp.lt.s32.totalorder %s118_s14, %s118_s14 }
  0x15   :  { %94 = verf.f32 %v39_v10 }
  0x16   :  { %96 = verf.f32 %v40_v11  ;;  %p125_p8 = por %p124_p7, %p123_p6 }
  0x18   :  { %p126_p9 = pnand %p125_p8, %p119_p5 }
  0x1e   :  { %v87_v13 = vpop.eup %86 }
  0x1f   :  { %v89_v15 = vpop.eup %88  ;;  %v47_v16 = vadd.f32 1.0, %v87_v13 }
  0x20   :  { %v91_v18 = vpop.eup %90  ;;  %v48_v19 = vadd.f32 1.0, %v89_v15 }
  0x21   :  { %v93_v21 = vpop.eup %92  ;;  %v53_v22 = vmul.f32 %v47_v16, %v29_v12  ;;  %v49_v23 = vadd.f32 1.0, %v91_v18 }
  0x22   :  { %v95_v25 = vpop.eup %94  ;;  %v54_v26 = vmul.f32 %v48_v19, %v30_v14  ;;  %v50_v27 = vadd.f32 1.0, %v93_v21 }
  0x23   :  { %v97_v29 = vpop.eup %96  ;;  %59 = vst [vmem:[#allocation5] sm:$0xff] %v53_v22  ;;  %v55_v30 = vmul.f32 %v49_v23, %v31_v17  ;;  %v51_v31 = vadd.f32 1.0, %v95_v25 }
  0x24   :  { %60 = vst [vmem:[#allocation5 + $0x8] sm:$0xff] %v54_v26  ;;  %v56_v32 = vmul.f32 %v50_v27, %v32_v20  ;;  %v52_v33 = vadd.f32 1.0, %v97_v29 }
  0x25   :  { %61 = vst [vmem:[#allocation5 + $0x10] sm:$0xff] %v55_v30  ;;  %v57_v34 = vmul.f32 %v51_v31, %v33_v24 }
  0x26   :  { %62 = vst [vmem:[#allocation5 + $0x18] sm:$0xff] %v56_v32  ;;  %v58_v35 = vmul.f32 %v52_v33, %v34_v28 }
  0x27   :  { %63 = vst [vmem:[#allocation5 + $0x20] sm:$0x1f] %v57_v34 }
  0x28   :  { %64 = vst [vmem:[#allocation5 + $0x28] sm:$0x1f] %v58_v35 }
  0x29   :  { %129 = shalt.err (!%p126_p9)
}
  0x2a   :  { %76 = dma.vmem_to_hbm [thread:$0]  %s71_s13, 768, %s169_s1, [#allocation4], %s143_s9, %s143_s9, %s144_s10  }
  0x2b   :  { %140 = dma.done.wait [#allocation4], 768  }
  0x2c   :  { %141 = vsyncadd [#allocation4], 4294966528 }
  0x2d   :  { %80 = vsyncpa [#allocation3], 1 }
  0x2e   :  { %81 = vsyncpa [#allocation4], 1 }

</bundles_post_ra>
